<compile_context>
chip_gen: v6e
topology: v6e:2x2x1
jax: 0.10.0
libtpu: 0.0.40
codegen_flags: <defaults>
</compile_context>

<pallas_src>
import functools

import jax
import jax.numpy as jnp
from jax.experimental import pallas as pl
from jax.experimental.pallas import tpu as pltpu

# ----------------------------- config ---------------------------------------
UNCONCAT_EMBED_DIM = 32
CONCAT_EMBED_DIM = 2 * UNCONCAT_EMBED_DIM          # 64 real features
HIDDEN_DIM = 2 * CONCAT_EMBED_DIM                  # 128 (already lane-dense)
PADDED_FEAT_DIM = 128                              # lane-padded feature width
LN_EPS = 1e-5

# categorical bond features -> vocab size
LABEL_ENCODED_BOND_FEATURES = {"bond_dir": 7, "bond_type": 5, "is_in_ring": 3}
# float bond features -> RBF config
FLOAT_BOND_FEATURES = {"bond_length": {"num_centers": 20, "lo": 0.0, "hi": 5.0, "gamma": 10.0}}


def _round_up(x, m):
    return ((x + m - 1) // m) * m


# ----------------------------- fused Pallas kernel ---------------------------
def _agg_gnn_kernel(tile_off_ref, edge_in_ref, dst_ref, h_node_ref,
                    we_ref, w1_ref, b1_ref, w2_ref, b2_ref, g_ref, beta_ref,
                    out_ref, acc_ref):
    """One (node-tile i, local edge-tile j) grid step of the fused forward.

    tile_off : (n_node_tiles,) int32 SMEM  per-node-tile edge-tile offset
               (scalar prefetch; consumed only by the index_maps)
    edge_in  : (te, 256) bf16   [r_emb | p_emb | r_basis | p_basis | h_src | 1 | 0-pad]
    dst      : (1, te)   int32  destination node id per edge (-1 on padded edges)
    h_node   : (tn, 128) f32    residual node features of this node tile (lanes >= 64 zero)
    we       : (256,128) bf16   fused projection: bond embed select + RBF Linear +
                                (react, prod-react) concat + h_src identity + bias row
    w1,b1,w2,b2,g,beta : MLP / LayerNorm params, zero-padded to 128 lanes
    out      : (tn, 128) f32 ;  acc : (tn, 128) f32 VMEM accumulator across edge tiles
    """
    del tile_off_ref                       # used only inside the BlockSpec index_maps
    i = pl.program_id(0)                   # node tile  ("parallel")
    j = pl.program_id(1)                   # local edge tile ("arbitrary" reduction)
    tn = out_ref.shape[0]
    te = edge_in_ref.shape[0]

    @pl.when(j == 0)
    def _():
        acc_ref[...] = jnp.zeros_like(acc_ref)

    # One K=256 bf16 matmul (f32 accumulate): bond embedding + RBF linear +
    # (react, prod-react) concat + gathered h[src] + folded bias -> full GIN message.
    msg = jnp.dot(edge_in_ref[...], we_ref[...],
                  preferred_element_type=jnp.float32)                     # (te, 128)
    # TODO(synk): msg is rounded to bf16 for the scatter matmul (f32 accumulate);
    # keep it f32 here if exact parity with the f32 PyTorch reference is required.

    # Scatter-add to the destination nodes of this node tile: one-hot incidence block
    # built in-kernel in MXU-native (tn, te) orientation (never materialized in HBM).
    oh = (i * tn + jax.lax.broadcasted_iota(jnp.int32, (tn, te), 0)
          == dst_ref[...]).astype(jnp.bfloat16)                            # (tn, te)
    acc_ref[...] += jnp.dot(oh, msg.astype(jnp.bfloat16),
                            preferred_element_type=jnp.float32)            # (tn, 128)

    # --- epilogue on last local edge tile: MLP -> LayerNorm -> ReLU -> residual ---
    @pl.when(j == pl.num_programs(1) - 1)
    def _():
        agg = acc_ref[...]
        h1 = jnp.dot(agg.astype(jnp.bfloat16), w1_ref[...],
                     preferred_element_type=jnp.float32) + b1_ref[...]
        h1 = jnp.maximum(h1, 0.0)
        # TODO(synk): dropout is identity (inference mode); training-mode dropout not implemented.
        out = jnp.dot(h1.astype(jnp.bfloat16), w2_ref[...],
                      preferred_element_type=jnp.float32) + b2_ref[...]    # (tn, 128)

        # LayerNorm over the 64 real feature lanes; lanes >= 64 are exact zeros only
        # because w2 / b2 / g / beta are zero-padded — keep that invariant.
        lane = jax.lax.broadcasted_iota(jnp.int32, out.shape, 1)
        mask = lane < CONCAT_EMBED_DIM
        inv_d = 1.0 / CONCAT_EMBED_DIM
        mean = jnp.sum(out, axis=-1, keepdims=True) * inv_d
        diff = jnp.where(mask, out - mean, 0.0)
        var = jnp.sum(diff * diff, axis=-1, keepdims=True) * inv_d
        y = diff * jax.lax.rsqrt(var + LN_EPS)
        y = y * g_ref[...] + beta_ref[...]
        y = jnp.maximum(y, 0.0)                       # has_last_act=True
        out_ref[...] = y + h_node_ref[...]            # residual connection


def aggregation_gnn_pallas(tile_off, edge_in, dst_row, h_pad,
                           w_edge, w1, b1, w2, b2, ln_g, ln_b,
                           *, tile_n, tile_e, max_edge_tiles, vmem_limit_bytes=None):
    n_pad, feat = h_pad.shape
    e_pad, k_pad = edge_in.shape
    assert tile_n % 8 == 0 and tile_e % 128 == 0            # lane-dense dst row block
    assert n_pad % tile_n == 0 and e_pad % tile_e == 0
    grid = (n_pad // tile_n, max_edge_tiles)

    def full_spec(arr):  # small params: fully resident
        return pl.BlockSpec(arr.shape, lambda i, j, off: (0, 0))

    return pl.pallas_call(
        _agg_gnn_kernel,
        out_shape=jax.ShapeDtypeStruct((n_pad, feat), jnp.float32),
        grid_spec=pltpu.PrefetchScalarGridSpec(
            num_scalar_prefetch=1,                           # tile_off -> SMEM
            grid=grid,
            in_specs=[
                # node tile i only walks its own (sorted-by-dst) edge window:
                pl.BlockSpec((tile_e, k_pad), lambda i, j, off: (off[i] + j, 0)),  # edge_in
                pl.BlockSpec((1, tile_e),     lambda i, j, off: (0, off[i] + j)),  # dst row
                pl.BlockSpec((tile_n, feat),  lambda i, j, off: (i, 0)),           # residual h
                full_spec(w_edge),
                full_spec(w1), full_spec(b1),
                full_spec(w2), full_spec(b2),
                full_spec(ln_g), full_spec(ln_b),
            ],
            out_specs=pl.BlockSpec((tile_n, feat), lambda i, j, off: (i, 0)),
            scratch_shapes=[pltpu.VMEM((tile_n, feat), jnp.float32)],
        ),
        compiler_params=pltpu.CompilerParams(
            dimension_semantics=("parallel", "arbitrary"),
            vmem_limit_bytes=vmem_limit_bytes),
    )(tile_off, edge_in, dst_row, h_pad, w_edge, w1, b1, w2, b2, ln_g, ln_b)


# ----------------------------- parameters ------------------------------------
def init_params(key):
    keys = jax.random.split(key, 16)
    ki = iter(keys)
    params = {"embed": {}, "rbf": {}}

    for name, vocab in LABEL_ENCODED_BOND_FEATURES.items():
        params["embed"][name] = 0.02 * jax.random.normal(
            next(ki), (vocab, UNCONCAT_EMBED_DIM), jnp.float32)

    for name, cfg in FLOAT_BOND_FEATURES.items():
        params["rbf"][name] = {
            "centers": jnp.linspace(cfg["lo"], cfg["hi"], cfg["num_centers"], dtype=jnp.float32),
            "w": 0.1 * jax.random.normal(next(ki), (cfg["num_centers"], UNCONCAT_EMBED_DIM),
                                         jnp.float32),
            "b": jnp.zeros((UNCONCAT_EMBED_DIM,), jnp.float32),
        }

    params["gnn"] = {
        "w1": 0.05 * jax.random.normal(next(ki), (CONCAT_EMBED_DIM, HIDDEN_DIM), jnp.float32),
        "b1": jnp.zeros((HIDDEN_DIM,), jnp.float32),
        "w2": 0.05 * jax.random.normal(next(ki), (HIDDEN_DIM, CONCAT_EMBED_DIM), jnp.float32),
        "b2": jnp.zeros((CONCAT_EMBED_DIM,), jnp.float32),
        "ln_g": jnp.ones((CONCAT_EMBED_DIM,), jnp.float32),
        "ln_b": jnp.zeros((CONCAT_EMBED_DIM,), jnp.float32),
    }
    return params


# ----------------------------- host helper ------------------------------------
def compute_max_edge_tiles(dst, num_atoms, *, tile_n, tile_e):
    """Eager/host helper: smallest STATIC per-node-tile edge-tile budget that covers
    every node tile's sorted-by-dst edge range (used as the second grid extent)."""
    num_edges = int(dst.shape[0])
    n_pad = _round_up(num_atoms, tile_n)
    e_pad = _round_up(num_edges, tile_e)
    total_etiles = e_pad // tile_e
    ds = jnp.sort(jnp.asarray(dst).astype(jnp.int32))
    need = 1
    for i in range(n_pad // tile_n):
        lo = int(jnp.searchsorted(ds, i * tile_n, side="left"))
        hi = int(jnp.searchsorted(ds, (i + 1) * tile_n, side="left"))
        if hi > lo:
            need = max(need, (hi - 1) // tile_e - lo // tile_e + 1)
    return min(need, total_etiles)


# ----------------------------- forward (glue + fused kernel) -----------------
def aggregation_gnn_forward(params, graph, superimposed_atom_repr, *,
                            tile_n=512, tile_e=4096, max_edge_tiles=None,
                            vmem_limit_bytes=None):
    """Fused AggregationGNN forward.

    max_edge_tiles: static per-node-tile edge-tile budget after sorting edges by dst.
      Must be >= the true requirement (see compute_max_edge_tiles) or edges are
      silently dropped; None -> conservative full edge pass per node tile.
    """
    src = graph["src"].astype(jnp.int32)
    dst = graph["dst"].astype(jnp.int32)
    num_atoms, in_dim = superimposed_atom_repr.shape
    num_edges = src.shape[0]
    assert in_dim == CONCAT_EMBED_DIM

    d, d2, feat = UNCONCAT_EMBED_DIM, CONCAT_EMBED_DIM, PADDED_FEAT_DIM
    n_pad = _round_up(num_atoms, tile_n)
    e_pad = _round_up(num_edges, tile_e)
    n_tiles = n_pad // tile_n
    total_etiles = e_pad // tile_e
    if max_edge_tiles is None:
        max_edge_tiles = total_etiles
    max_edge_tiles = max(1, min(int(max_edge_tiles), total_etiles))

    r_feats = {k[2:]: v for k, v in graph["edata"].items() if k.startswith("r_")}
    p_feats = {k[2:]: v for k, v in graph["edata"].items() if k.startswith("p_")}

    # --- tiny data-dependent gathers / basis expansion stay in JAX glue ------
    def embed_sum(feats):
        out = jnp.zeros((num_edges, d), jnp.float32)
        for name in LABEL_ENCODED_BOND_FEATURES:
            out = out + params["embed"][name][feats[name]]
        return out

    def rbf_basis(feats):
        parts = []
        for name, cfg in FLOAT_BOND_FEATURES.items():
            x = feats[name].astype(jnp.float32)
            centers = params["rbf"][name]["centers"]
            parts.append(jnp.exp(-cfg["gamma"] * (x[:, None] - centers[None, :]) ** 2))
        return jnp.concatenate(parts, axis=1)                              # (E, C)

    r_emb, p_emb = embed_sum(r_feats), embed_sum(p_feats)
    r_basis, p_basis = rbf_basis(r_feats), rbf_basis(p_feats)

    # --- sort edges by destination so each node tile owns a contiguous edge window --
    order = jnp.argsort(dst)
    dst_s, src_s = dst[order], src[order]
    r_emb, p_emb = r_emb[order], p_emb[order]
    r_basis, p_basis = r_basis[order], p_basis[order]
    h_src = superimposed_atom_repr.astype(jnp.float32)[src_s]               # (E, 64)

    # per-node-tile edge-tile offsets (scalar prefetch), clamped so the fixed-size
    # window of max_edge_tiles tiles stays in bounds; extra edges in the window are
    # killed by the in-kernel one-hot.
    bounds = jnp.arange(n_tiles, dtype=jnp.int32) * tile_n
    edge_start = jnp.searchsorted(dst_s, bounds, side="left").astype(jnp.int32)
    tile_off = jnp.clip(edge_start // tile_e, 0,
                        total_etiles - max_edge_tiles).astype(jnp.int32)

    # --- one lane-dense K=256 edge slab; RBF Linear + (react, prod-react) concat,
    #     the gathered h[src] identity block and the bias row are folded into W_edge.
    ones = jnp.ones((num_edges, 1), jnp.float32)
    edge_in = jnp.concatenate([r_emb, p_emb, r_basis, p_basis, h_src, ones], axis=1)
    k0 = edge_in.shape[1]
    k_pad = _round_up(k0, 128)                                              # 256
    edge_in = jnp.pad(edge_in, ((0, e_pad - num_edges), (0, k_pad - k0))).astype(jnp.bfloat16)

    eye_d = jnp.eye(d, dtype=jnp.float32)
    tail = jnp.zeros((d, feat - d2), jnp.float32)
    s_r = jnp.concatenate([eye_d, -eye_d, tail], axis=1)                    # r -> [+r | -r | 0]
    s_p = jnp.concatenate([jnp.zeros((d, d), jnp.float32), eye_d, tail], axis=1)  # p -> [0|+p|0]
    w_rbf = jnp.concatenate([params["rbf"][n]["w"] for n in FLOAT_BOND_FEATURES], axis=0)
    b_rbf = sum(params["rbf"][n]["b"] for n in FLOAT_BOND_FEATURES).reshape(1, d)
    h_rows = jnp.concatenate([jnp.eye(d2, dtype=jnp.float32),
                              jnp.zeros((d2, feat - d2), jnp.float32)], axis=1)    # h[src] id
    b_row = b_rbf @ s_r + b_rbf @ s_p                                              # folded bias
    w_edge = jnp.concatenate([s_r, s_p, w_rbf @ s_r, w_rbf @ s_p, h_rows, b_row], axis=0)
    assert w_edge.shape[0] == k0
    w_edge = jnp.pad(w_edge, ((0, k_pad - k0), (0, 0))).astype(jnp.bfloat16)       # (256, 128)

    # --- lane-dense dst row; padded edges get dst = -1 (never matches a node id) ----
    dst_row = jnp.pad(dst_s, (0, e_pad - num_edges), constant_values=-1).reshape(1, e_pad)

    # --- residual node features padded to 128 lanes ----------------------------------
    h_pad = jnp.pad(superimposed_atom_repr.astype(jnp.float32),
                    ((0, n_pad - num_atoms), (0, feat - d2)))

    # --- MLP / LayerNorm params, zero-padded to 128 lanes (LN mask relies on this) ---
    g = params["gnn"]
    w1 = jnp.pad(g["w1"], ((0, feat - d2), (0, 0))).astype(jnp.bfloat16)            # (128, 128)
    b1 = g["b1"].reshape(1, HIDDEN_DIM).astype(jnp.float32)
    w2 = jnp.pad(g["w2"], ((0, 0), (0, feat - d2))).astype(jnp.bfloat16)            # (128, 128)
    b2 = jnp.pad(g["b2"].reshape(1, d2), ((0, 0), (0, feat - d2)))
    ln_g = jnp.pad(g["ln_g"].reshape(1, d2), ((0, 0), (0, feat - d2)))
    ln_b = jnp.pad(g["ln_b"].reshape(1, d2), ((0, 0), (0, feat - d2)))

    out = aggregation_gnn_pallas(tile_off, edge_in, dst_row, h_pad,
                                 w_edge, w1, b1, w2, b2, ln_g, ln_b,
                                 tile_n=tile_n, tile_e=tile_e,
                                 max_edge_tiles=max_edge_tiles,
                                 vmem_limit_bytes=vmem_limit_bytes)
    return out[:num_atoms, :d2]


# ----------------------------- pure-JAX reference (validation) ---------------
def aggregation_gnn_reference(params, graph, h):
    src, dst = graph["src"].astype(jnp.int32), graph["dst"].astype(jnp.int32)
    r_feats = {k[2:]: v for k, v in graph["edata"].items() if k.startswith("r_")}
    p_feats = {k[2:]: v for k, v in graph["edata"].items() if k.startswith("p_")}

    def embed_sum(feats):
        out = 0.0
        for name in LABEL_ENCODED_BOND_FEATURES:
            out = out + params["embed"][name][feats[name]]
        return out

    def rbf(feats):
        out = 0.0
        for name, cfg in FLOAT_BOND_FEATURES.items():
            x = feats[name].astype(jnp.float32)
            c = params["rbf"][name]["centers"]
            basis = jnp.exp(-cfg["gamma"] * (x[:, None] - c[None, :]) ** 2)
            out = out + basis @ params["rbf"][name]["w"] + params["rbf"][name]["b"]
        return out

    r = embed_sum(r_feats) + rbf(r_feats)
    p = embed_sum(p_feats) + rbf(p_feats)
    edge_feat = jnp.concatenate([r, p - r], axis=1)
    msg = h[src] + edge_feat
    agg = jnp.zeros((h.shape[0], CONCAT_EMBED_DIM), jnp.float32).at[dst].add(msg)
    g = params["gnn"]
    h1 = jnp.maximum(agg @ g["w1"] + g["b1"], 0.0)
    out = h1 @ g["w2"] + g["b2"]
    mean = out.mean(axis=-1, keepdims=True)
    var = ((out - mean) ** 2).mean(axis=-1, keepdims=True)
    y = (out - mean) * jax.lax.rsqrt(var + LN_EPS) * g["ln_g"] + g["ln_b"]
    return jnp.maximum(y, 0.0) + h


# ----------------------------- demo ------------------------------------------
if __name__ == "__main__":
    key = jax.random.PRNGKey(0)
    k_params, k_repr, k_src, k_dst, k_r, k_p = jax.random.split(key, 6)

    NUM_ATOMS, NUM_EDGES = 48, 300
    TILE_N, TILE_E = 16, 128          # small demo tiles (production defaults: 512 / 4096)

    params = init_params(k_params)

    superimposed_atom_repr = jax.random.normal(
        k_repr, (NUM_ATOMS, CONCAT_EMBED_DIM), jnp.float32)

    src = jax.random.randint(k_src, (NUM_EDGES,), 0, NUM_ATOMS, jnp.int32)
    dst = jax.random.randint(k_dst, (NUM_EDGES,), 0, NUM_ATOMS, jnp.int32)

    def make_edge_feats(k, prefix):
        ks = jax.random.split(k, 4)
        return {
            f"{prefix}bond_dir": jax.random.randint(ks[0], (NUM_EDGES,), 0, 7, jnp.int32),
            f"{prefix}bond_type": jax.random.randint(ks[1], (NUM_EDGES,), 0, 5, jnp.int32),
            f"{prefix}is_in_ring": jax.random.randint(ks[2], (NUM_EDGES,), 0, 3, jnp.int32),
            f"{prefix}bond_length": jax.random.uniform(ks[3], (NUM_EDGES,), jnp.float32, 0.5, 4.5),
        }

    edata = {}
    edata.update(make_edge_feats(k_r, "r_"))
    edata.update(make_edge_feats(k_p, "p_"))
    graph = {"src": src, "dst": dst, "edata": edata}

    # static per-node-tile edge-tile budget, derived host-side from the concrete dst
    max_et = compute_max_edge_tiles(dst, NUM_ATOMS, tile_n=TILE_N, tile_e=TILE_E)

    fwd = jax.jit(functools.partial(aggregation_gnn_forward,
                                    tile_n=TILE_N, tile_e=TILE_E,
                                    max_edge_tiles=max_et))
    out = jax.block_until_ready(fwd(params, graph, superimposed_atom_repr))

    assert out.shape == (NUM_ATOMS, CONCAT_EMBED_DIM)
    assert out.dtype == jnp.float32
    assert bool(jnp.all(jnp.isfinite(out)))

    # loose tolerance: kernel uses bf16 MXU inputs with f32 accumulation
    ref = aggregation_gnn_reference(params, graph, superimposed_atom_repr)
    max_err = float(jnp.max(jnp.abs(out - ref)))
    assert max_err < 0.3, f"kernel/reference mismatch: max abs err = {max_err}"

    print("KERNEL_OK")
</pallas_src>

<mosaic_0001>
module attributes {stable_mosaic.version = 11 : i64} {
  func.func @_agg_gnn_kernel(%arg0: i32, %arg1: i32, %arg2: memref<3xi32, #tpu.memory_space<smem>>, %arg3: memref<128x256xbf16, #tpu.memory_space<vmem>>, %arg4: memref<1x128xi32, #tpu.memory_space<vmem>>, %arg5: memref<16x128xf32, #tpu.memory_space<vmem>>, %arg6: memref<256x128xbf16, #tpu.memory_space<vmem>>, %arg7: memref<128x128xbf16, #tpu.memory_space<vmem>>, %arg8: memref<1x128xf32, #tpu.memory_space<vmem>>, %arg9: memref<128x128xbf16, #tpu.memory_space<vmem>>, %arg10: memref<1x128xf32, #tpu.memory_space<vmem>>, %arg11: memref<1x128xf32, #tpu.memory_space<vmem>>, %arg12: memref<1x128xf32, #tpu.memory_space<vmem>>, %arg13: memref<16x128xf32, #tpu.memory_space<vmem>>, %arg14: memref<16x128xf32, #tpu.memory_space<vmem>>) attributes {dimension_semantics = [#tpu.dimension_semantics<parallel>, #tpu.dimension_semantics<arbitrary>], iteration_bounds = array<i64: 3, 2>, scalar_prefetch = 1 : i64, scratch_operands = 1 : i64, tpu.core_type = #tpu.core_type<tc>, window_params = [{transform_indices = @transform_0, window_bounds = array<i64: 128, 256>}, {transform_indices = @transform_1, window_bounds = array<i64: 1, 128>}, {transform_indices = @transform_2, window_bounds = array<i64: 16, 128>}, {pipeline_mode = #tpu.pipeline_mode<synchronous>, transform_indices = @transform_3, window_bounds = array<i64: 256, 128>}, {pipeline_mode = #tpu.pipeline_mode<synchronous>, transform_indices = @transform_4, window_bounds = array<i64: 128, 128>}, {pipeline_mode = #tpu.pipeline_mode<synchronous>, transform_indices = @transform_5, window_bounds = array<i64: 1, 128>}, {pipeline_mode = #tpu.pipeline_mode<synchronous>, transform_indices = @transform_6, window_bounds = array<i64: 128, 128>}, {pipeline_mode = #tpu.pipeline_mode<synchronous>, transform_indices = @transform_7, window_bounds = array<i64: 1, 128>}, {pipeline_mode = #tpu.pipeline_mode<synchronous>, transform_indices = @transform_8, window_bounds = array<i64: 1, 128>}, {pipeline_mode = #tpu.pipeline_mode<synchronous>, transform_indices = @transform_9, window_bounds = array<i64: 1, 128>}, {transform_indices = @transform_10, window_bounds = array<i64: 16, 128>}]} {
    %c0_i32 = arith.constant 0 : i32
    %0 = arith.cmpi eq, %arg1, %c0_i32 : i32
    %1 = arith.extui %0 : i1 to i32
    %c0_i32_0 = arith.constant 0 : i32
    %2 = arith.cmpi ne, %1, %c0_i32_0 : i32
    scf.if %2 {
      %cst_12 = arith.constant 0.000000e+00 : f32
      %24 = vector.broadcast %cst_12 : f32 to vector<16x128xf32>
      %c0_13 = arith.constant 0 : index
      %c0_14 = arith.constant 0 : index
      %25 = vector.load %arg14[%c0_13, %c0_14] : memref<16x128xf32, #tpu.memory_space<vmem>>, vector<16x128xf32>
      tpu.vector_store %arg14[%c0_13, %c0_14], %24 {strides = array<i32>} : memref<16x128xf32, #tpu.memory_space<vmem>>, vector<16x128xf32>,
    } else {
    }
    %c0 = arith.constant 0 : index
    %c0_1 = arith.constant 0 : index
    %3 = vector.load %arg3[%c0, %c0_1] : memref<128x256xbf16, #tpu.memory_space<vmem>>, vector<128x256xbf16>
    %c0_2 = arith.constant 0 : index
    %c0_3 = arith.constant 0 : index
    %4 = vector.load %arg6[%c0_2, %c0_3] : memref<256x128xbf16, #tpu.memory_space<vmem>>, vector<256x128xbf16>
    %cst = arith.constant dense<0.000000e+00> : vector<128x128xf32>
    %5 = tpu.matmul %3, %4, %cst {dimension_numbers = #tpu.dot_dimension_numbers<[1], [0], [0], [1], [0, 0, 1, 1], [], []>} : vector<128x256xbf16>, vector<256x128xbf16>, vector<128x128xf32> -> vector<128x128xf32>
    %c16_i32 = arith.constant 16 : i32
    %6 = arith.muli %arg0, %c16_i32 : i32
    %7 = tpu.iota {dimensions = array<i32: 0>} : vector<16x128xi32>
    %8 = vector.broadcast %6 : i32 to vector<16x128xi32>
    %9 = arith.addi %8, %7 : vector<16x128xi32>
    %c0_4 = arith.constant 0 : index
    %c0_5 = arith.constant 0 : index
    %10 = vector.load %arg4[%c0_4, %c0_5] : memref<1x128xi32, #tpu.memory_space<vmem>>, vector<1x128xi32>
    %11 = vector.broadcast %10 : vector<1x128xi32> to vector<16x128xi32>
    %12 = arith.cmpi eq, %9, %11 : vector<16x128xi32>
    %13 = arith.extui %12 : vector<16x128xi1> to vector<16x128xi32>
    %14 = arith.sitofp %13 : vector<16x128xi32> to vector<16x128xf32>
    %15 = arith.truncf %14 : vector<16x128xf32> to vector<16x128xbf16>
    %c0_6 = arith.constant 0 : index
    %c0_7 = arith.constant 0 : index
    %16 = vector.load %arg14[%c0_6, %c0_7] : memref<16x128xf32, #tpu.memory_space<vmem>>, vector<16x128xf32>
    %17 = arith.truncf %5 : vector<128x128xf32> to vector<128x128xbf16>
    %cst_8 = arith.constant dense<0.000000e+00> : vector<16x128xf32>
    %18 = tpu.matmul %15, %17, %cst_8 {dimension_numbers = #tpu.dot_dimension_numbers<[1], [0], [0], [1], [0, 0, 1, 1], [], []>} : vector<16x128xbf16>, vector<128x128xbf16>, vector<16x128xf32> -> vector<16x128xf32>
    %19 = arith.addf %16, %18 : vector<16x128xf32>
    %c0_9 = arith.constant 0 : index
    %c0_10 = arith.constant 0 : index
    %20 = vector.load %arg14[%c0_9, %c0_10] : memref<16x128xf32, #tpu.memory_space<vmem>>, vector<16x128xf32>
    tpu.vector_store %arg14[%c0_9, %c0_10], %19 {strides = array<i32>} : memref<16x128xf32, #tpu.memory_space<vmem>>, vector<16x128xf32>,
    %c1_i32 = arith.constant 1 : i32
    %21 = arith.cmpi eq, %arg1, %c1_i32 : i32
    %22 = arith.extui %21 : i1 to i32
    %c0_i32_11 = arith.constant 0 : i32
    %23 = arith.cmpi ne, %22, %c0_i32_11 : i32
    scf.if %23 {
      %c0_12 = arith.constant 0 : index
      %c0_13 = arith.constant 0 : index
      %24 = vector.load %arg14[%c0_12, %c0_13] : memref<16x128xf32, #tpu.memory_space<vmem>>, vector<16x128xf32>
      %25 = arith.truncf %24 : vector<16x128xf32> to vector<16x128xbf16>
      %c0_14 = arith.constant 0 : index
      %c0_15 = arith.constant 0 : index
      %26 = vector.load %arg7[%c0_14, %c0_15] : memref<128x128xbf16, #tpu.memory_space<vmem>>, vector<128x128xbf16>
      %cst_16 = arith.constant dense<0.000000e+00> : vector<16x128xf32>
      %27 = tpu.matmul %25, %26, %cst_16 {dimension_numbers = #tpu.dot_dimension_numbers<[1], [0], [0], [1], [0, 0, 1, 1], [], []>} : vector<16x128xbf16>, vector<128x128xbf16>, vector<16x128xf32> -> vector<16x128xf32>
      %c0_17 = arith.constant 0 : index
      %c0_18 = arith.constant 0 : index
      %28 = vector.load %arg8[%c0_17, %c0_18] : memref<1x128xf32, #tpu.memory_space<vmem>>, vector<1x128xf32>
      %29 = vector.broadcast %28 : vector<1x128xf32> to vector<16x128xf32>
      %30 = arith.addf %27, %29 : vector<16x128xf32>
      %cst_19 = arith.constant 0.000000e+00 : f32
      %31 = vector.broadcast %cst_19 : f32 to vector<16x128xf32>
      %32 = arith.maximumf %30, %31 : vector<16x128xf32>
      %33 = arith.truncf %32 : vector<16x128xf32> to vector<16x128xbf16>
      %c0_20 = arith.constant 0 : index
      %c0_21 = arith.constant 0 : index
      %34 = vector.load %arg9[%c0_20, %c0_21] : memref<128x128xbf16, #tpu.memory_space<vmem>>, vector<128x128xbf16>
      %cst_22 = arith.constant dense<0.000000e+00> : vector<16x128xf32>
      %35 = tpu.matmul %33, %34, %cst_22 {dimension_numbers = #tpu.dot_dimension_numbers<[1], [0], [0], [1], [0, 0, 1, 1], [], []>} : vector<16x128xbf16>, vector<128x128xbf16>, vector<16x128xf32> -> vector<16x128xf32>
      %c0_23 = arith.constant 0 : index
      %c0_24 = arith.constant 0 : index
      %36 = vector.load %arg10[%c0_23, %c0_24] : memref<1x128xf32, #tpu.memory_space<vmem>>, vector<1x128xf32>
      %37 = vector.broadcast %36 : vector<1x128xf32> to vector<16x128xf32>
      %38 = arith.addf %35, %37 : vector<16x128xf32>
      %39 = tpu.iota {dimensions = array<i32: 1>} : vector<16x128xi32>
      %c64_i32 = arith.constant 64 : i32
      %40 = vector.broadcast %c64_i32 : i32 to vector<16x128xi32>
      %41 = arith.cmpi slt, %39, %40 : vector<16x128xi32>
      %cst_25 = arith.constant dense<0.000000e+00> : vector<16xf32>
      %42 = vector.multi_reduction <add>, %38, %cst_25 [1] : vector<16x128xf32> to vector<16xf32>
      %43 = vector.shape_cast %42 : vector<16xf32> to vector<16x1xf32>
      %cst_26 = arith.constant 1.562500e-02 : f32
      %44 = vector.broadcast %cst_26 : f32 to vector<16x1xf32>
      %45 = arith.mulf %43, %44 : vector<16x1xf32>
      %46 = vector.broadcast %45 : vector<16x1xf32> to vector<16x128xf32>
      %47 = arith.subf %38, %46 : vector<16x128xf32>
      %cst_27 = arith.constant 0.000000e+00 : f32
      %48 = vector.broadcast %cst_27 : f32 to vector<16x128xf32>
      %49 = arith.select %41, %47, %48 : vector<16x128xi1>, vector<16x128xf32>
      %50 = arith.mulf %49, %49 : vector<16x128xf32>
      %cst_28 = arith.constant dense<0.000000e+00> : vector<16xf32>
      %51 = vector.multi_reduction <add>, %50, %cst_28 [1] : vector<16x128xf32> to vector<16xf32>
      %52 = vector.shape_cast %51 : vector<16xf32> to vector<16x1xf32>
      %cst_29 = arith.constant 1.562500e-02 : f32
      %53 = vector.broadcast %cst_29 : f32 to vector<16x1xf32>
      %54 = arith.mulf %52, %53 : vector<16x1xf32>
      %cst_30 = arith.constant 9.99999974E-6 : f32
      %55 = vector.broadcast %cst_30 : f32 to vector<16x1xf32>
      %56 = arith.addf %54, %55 : vector<16x1xf32>
      %57 = math.rsqrt %56 : vector<16x1xf32>
      %58 = vector.broadcast %57 : vector<16x1xf32> to vector<16x128xf32>
      %59 = arith.mulf %49, %58 : vector<16x128xf32>
      %c0_31 = arith.constant 0 : index
      %c0_32 = arith.constant 0 : index
      %60 = vector.load %arg11[%c0_31, %c0_32] : memref<1x128xf32, #tpu.memory_space<vmem>>, vector<1x128xf32>
      %61 = vector.broadcast %60 : vector<1x128xf32> to vector<16x128xf32>
      %62 = arith.mulf %59, %61 : vector<16x128xf32>
      %c0_33 = arith.constant 0 : index
      %c0_34 = arith.constant 0 : index
      %63 = vector.load %arg12[%c0_33, %c0_34] : memref<1x128xf32, #tpu.memory_space<vmem>>, vector<1x128xf32>
      %64 = vector.broadcast %63 : vector<1x128xf32> to vector<16x128xf32>
      %65 = arith.addf %62, %64 : vector<16x128xf32>
      %cst_35 = arith.constant 0.000000e+00 : f32
      %66 = vector.broadcast %cst_35 : f32 to vector<16x128xf32>
      %67 = arith.maximumf %65, %66 : vector<16x128xf32>
      %c0_36 = arith.constant 0 : index
      %c0_37 = arith.constant 0 : index
      %68 = vector.load %arg5[%c0_36, %c0_37] : memref<16x128xf32, #tpu.memory_space<vmem>>, vector<16x128xf32>
      %69 = arith.addf %67, %68 : vector<16x128xf32>
      %c0_38 = arith.constant 0 : index
      %c0_39 = arith.constant 0 : index
      %70 = vector.load %arg13[%c0_38, %c0_39] : memref<16x128xf32, #tpu.memory_space<vmem>>, vector<16x128xf32>
      tpu.vector_store %arg13[%c0_38, %c0_39], %69 {strides = array<i32>} : memref<16x128xf32, #tpu.memory_space<vmem>>, vector<16x128xf32>,
    } else {
    }
    return
  }
  func.func @transform_0(%arg0: i32, %arg1: i32, %arg2: memref<3xi32, #tpu.memory_space<smem>>) -> (i32, i32) {
    %0 = arith.index_cast %arg0 : i32 to index
    %1 = memref.load %arg2[%0] : memref<3xi32, #tpu.memory_space<smem>>
    %2 = arith.addi %1, %arg1 : i32
    %c0_i32 = arith.constant 0 : i32
    %c0_i32_0 = arith.constant 0 : i32
    return %2, %c0_i32 : i32, i32
  }
  func.func @transform_1(%arg0: i32, %arg1: i32, %arg2: memref<3xi32, #tpu.memory_space<smem>>) -> (i32, i32) {
    %0 = arith.index_cast %arg0 : i32 to index
    %1 = memref.load %arg2[%0] : memref<3xi32, #tpu.memory_space<smem>>
    %2 = arith.addi %1, %arg1 : i32
    %c0_i32 = arith.constant 0 : i32
    %c0_i32_0 = arith.constant 0 : i32
    return %c0_i32, %2 : i32, i32
  }
  func.func @transform_2(%arg0: i32, %arg1: i32, %arg2: memref<3xi32, #tpu.memory_space<smem>>) -> (i32, i32) {
    %c0_i32 = arith.constant 0 : i32
    %c0_i32_0 = arith.constant 0 : i32
    return %arg0, %c0_i32 : i32, i32
  }
  func.func @transform_3(%arg0: i32, %arg1: i32, %arg2: memref<3xi32, #tpu.memory_space<smem>>) -> (i32, i32) {
    %c0_i32 = arith.constant 0 : i32
    %c0_i32_0 = arith.constant 0 : i32
    %c0_i32_1 = arith.constant 0 : i32
    return %c0_i32, %c0_i32_0 : i32, i32
  }
  func.func @transform_4(%arg0: i32, %arg1: i32, %arg2: memref<3xi32, #tpu.memory_space<smem>>) -> (i32, i32) {
    %c0_i32 = arith.constant 0 : i32
    %c0_i32_0 = arith.constant 0 : i32
    %c0_i32_1 = arith.constant 0 : i32
    return %c0_i32, %c0_i32_0 : i32, i32
  }
  func.func @transform_5(%arg0: i32, %arg1: i32, %arg2: memref<3xi32, #tpu.memory_space<smem>>) -> (i32, i32) {
    %c0_i32 = arith.constant 0 : i32
    %c0_i32_0 = arith.constant 0 : i32
    %c0_i32_1 = arith.constant 0 : i32
    return %c0_i32, %c0_i32_0 : i32, i32
  }
  func.func @transform_6(%arg0: i32, %arg1: i32, %arg2: memref<3xi32, #tpu.memory_space<smem>>) -> (i32, i32) {
    %c0_i32 = arith.constant 0 : i32
    %c0_i32_0 = arith.constant 0 : i32
    %c0_i32_1 = arith.constant 0 : i32
    return %c0_i32, %c0_i32_0 : i32, i32
  }
  func.func @transform_7(%arg0: i32, %arg1: i32, %arg2: memref<3xi32, #tpu.memory_space<smem>>) -> (i32, i32) {
    %c0_i32 = arith.constant 0 : i32
    %c0_i32_0 = arith.constant 0 : i32
    %c0_i32_1 = arith.constant 0 : i32
    return %c0_i32, %c0_i32_0 : i32, i32
  }
  func.func @transform_8(%arg0: i32, %arg1: i32, %arg2: memref<3xi32, #tpu.memory_space<smem>>) -> (i32, i32) {
    %c0_i32 = arith.constant 0 : i32
    %c0_i32_0 = arith.constant 0 : i32
    %c0_i32_1 = arith.constant 0 : i32
    return %c0_i32, %c0_i32_0 : i32, i32
  }
  func.func @transform_9(%arg0: i32, %arg1: i32, %arg2: memref<3xi32, #tpu.memory_space<smem>>) -> (i32, i32) {
    %c0_i32 = arith.constant 0 : i32
    %c0_i32_0 = arith.constant 0 : i32
    %c0_i32_1 = arith.constant 0 : i32
    return %c0_i32, %c0_i32_0 : i32, i32
  }
  func.func @transform_10(%arg0: i32, %arg1: i32, %arg2: memref<3xi32, #tpu.memory_space<smem>>) -> (i32, i32) {
    %c0_i32 = arith.constant 0 : i32
    %c0_i32_0 = arith.constant 0 : i32
    return %arg0, %c0_i32 : i32, i32
  }
}

</mosaic_0001>

<bundles_post_ra>
// kernel: custom-call
= control target key start
LH: loop header
LB: loop body
LE: loop exit
PB: predicated region body
PF: predicated region fallthrough
CT: control target
= control target key end

     0   :  { %s6_s0 = inlined_call_operand.vmem [shape: u32[3], index: 0, kind: output, shape index: {}]  }

// kernel: aggregation_gnn_forward.1
= control target key start
LH: loop header
LB: loop body
LE: loop exit
PB: predicated region body
PF: predicated region fallthrough
CT: control target
= control target key end

     0   :  { %s2113_s0 = inlined_call_operand.vmem [shape: s32[3], index: 0, kind: input, shape index: {}]   ;;  %s2114_s1 = inlined_call_operand.vmem [shape: bf16[384,256], index: 1, kind: input, shape index: {}]   ;;  %s2115_s2 = inlined_call_operand.vmem [shape: s32[1,384], index: 2, kind: input, shape index: {}]   ;;  %s2116_s3 = inlined_call_operand.vmem [shape: f32[48,128], index: 3, kind: input, shape index: {}]   ;;  %s2117_s4 = inlined_call_operand.vmem [shape: bf16[256,128], index: 4, kind: input, shape index: {}]   ;;  %s2118_s5 = inlined_call_operand.vmem [shape: bf16[128,128], index: 5, kind: input, shape index: {}]   ;;  %s2119_s6 = inlined_call_operand.vmem [shape: f32[1,128], index: 6, kind: input, shape index: {}]   ;;  %s2120_s7 = inlined_call_operand.vmem [shape: bf16[128,128], index: 7, kind: input, shape index: {}]   ;;  %s2121_s8 = inlined_call_operand.vmem [shape: f32[1,128], index: 8, kind: input, shape index: {}]   ;;  %s2122_s9 = inlined_call_operand.vmem [shape: f32[1,128], index: 9, kind: input, shape index: {}]   ;;  %s2123_s10 = inlined_call_operand.vmem [shape: f32[1,128], index: 10, kind: input, shape index: {}]   ;;  %s2124_s11 = inlined_call_operand.hbm [shape: f32[48,128], index: 11, kind: output, shape index: {}]  }
   0x1   :  { %s16_s19 = sshll.u32 %s2113_s0, 4  ;;  %s17_s19 = int_to_ptr.vmem [resolvable:$true] %s16_s19 }
   0x2   :  { %s1613_s20 = scalar_lea.vmem %s17_s19, 16  ;;  %p1618_p1 = scmp.lt.s32.totalorder %s17_s19, %s17_s19 }
   0x3   :  { %p1614_p0 = scmp.ne.s32.totalorder %s17_s19, %s1613_s20  ;;  %p1619_p2 = scmp.lt.s32.totalorder %s1613_s20, %s1613_s20 }
   0x5   :  { %p1620_p3 = por %p1619_p2, %p1618_p1 }
   0x7   :  { %p1621_p4 = pnand %p1620_p3, %p1614_p0 }
   0x9   :  { %1624 = shalt.err (!%p1621_p4)  }
   0xa   :  { %s1721_s21 = smov [#allocation4]  }
   0xb   :  { %19 = dma.vmem_to_smem %s17_s19, 16, %s1721_s21, [#allocation3] }
   0xc   :  { %1683 = dma.done.wait [#allocation3], 16 }
   0xd   :  { %1684 = vsyncadd [#allocation3], 4294967280 }
   0xe   :  { %21 = sfence }
   0xf   :  { %22 = vsyncpa [#allocation6], 0 }
  0x10   :  { %24 = vsyncpa [#allocation6 + $0x1], 0  ;;  %s1794_s22 = smov 0   ;;  %s1796_s23 = smov 0  }
  0x11   :  { %s1798_s0 = smov 0   ;;  %s1800_s24 = smov 0  }
  0x12   :  { %s1802_s25 = smov 0   ;;  %s1804_s26 = smov 0  }
  0x13   :  { %s1806_s27 = smov 0   ;;  %s1808_s28 = smov 0  }
  0x14 LB: > { %2132 = sst [smem:[#allocation9_spill]] %s1691_s22  ;;  %s1244_s29 = sadd.s32 4294967295, %s1719_s28   ;;  %s1719_s28 = sphi %s1808_s28, %s30_s28   ;;  %s1715_s27 = sphi %s1806_s27, %s2150_s27   ;;  %s1711_s26 = sphi %s1804_s26, %s2149_s26   ;;  %s1707_s25 = sphi %s1802_s25, %s2148_s25   ;;  %s1703_s24 = sphi %s1800_s24, %s2153_s24   ;;  %s1699_s0 = sphi %s1798_s0, %s2146_s0   ;;  %s1695_s23 = sphi %s1796_s23, %s2152_s23   ;;  %s1691_s22 = sphi %s1794_s22, %s2151_s22  }
  0x15   : > { %2133 = sst [smem:[#allocation10_spill]] %s1699_s0  ;;  %s1245_s30 = sadd.s32 4294967294, %s1719_s28  }
  0x16   : > { %2134 = sst [smem:[#allocation11_spill]] %s1711_s26  ;;  %s39_s12 = sadd.s32 1, %s1711_s26 }
  0x17   : > { %2135 = sst [smem:[#allocation12_spill]] %s1715_s27  ;;  %p40_p5 = scmp.ge.s32.totalorder %s39_s12, 2 }
  0x18   : > { %s42_s13 = sadd.s32 1, %s1715_s27  ;;  %p292_p6 = scmp.ne.s32.totalorder %s1699_s0, %s1695_s23 }
  0x19   : > { %p293_p7 = scmp.eq.s32.totalorder %s1244_s29, 5  ;;  %s2155_s12 = smov (%p40_p5, %s39_s12), 0 }
  0x1a   : > { %2136 = sst [smem:[#allocation13_spill]] %s2155_s12  ;;  %s2157_s13 = smov (!%p40_p5, %s42_s13), %s1715_s27 }
  0x1b   : > { %p1843_p8 = por %p293_p7, %p292_p6  ;;  %p298_p9 = scmp.ne.s32.totalorder %s1695_s23, %s1691_s22 }
  0x1c   : > { %p44_p10 = scmp.ge.s32.totalorder %s2157_s13, 3  ;;  %p299_p11 = scmp.eq.s32.totalorder %s1245_s30, 5 }
  0x1d   : > { %p1248_p12 = scmp.ge.s32.totalorder %s1719_s28, 1  ;;  %p371_p13 = scmp.lt.s32.totalorder %s1719_s28, 7 }
  0x1e   : > { %s2159_s13 = smov (%p44_p10, %s2157_s13), 0  ;;  %p1853_p0 = por %p299_p11, %p298_p9 }
  0x1f   : > { %2138 = sst [smem:[#allocation14_spill]] %s2159_s13  ;;  %p372_p1 = pnand %p1248_p12, %p371_p13 }
  0x20   : > { %s2139_s15 = scalar_select %p1853_p0, 1, 0 }
  0x21   : > { %s279_s16 = ssub.s32 %s1715_s27, %s2159_s13  ;;  %s282_s17 = sadd.s32 1, %s1699_s0 }
  0x22   : > { %2140 = sst [smem:[#allocation15_spill]] %s2139_s15  ;;  %p280_p2 = scmp.eq.s32.totalorder %s279_s16, 0 }
  0x23   : > { %375 = sbr.rel (%p372_p1) target bundleno = 1348 (0x544), region = 60  ;;  %s2129_s19 = sand.u32 (!%p372_p1), 1, %s1695_s23  }
  0x24   : > { %s1861_s18 = scalar_select %p280_p2, %s1699_s0, %s282_s17  }
  0x25   : > { %s422_s20 = sld [smem:[#allocation4 + %s1707_s25]] (!%p372_p1)  ;;  %s1249_s21 = sshll.u32 (!%p372_p1), %s2129_s19, 4 }
  0x26   : > { %2141 = sst [smem:[#allocation16_spill]] %s1861_s18  ;;  %s1253_s30 = sshll.u32 (!%p372_p1), %s1707_s25, 1 }
  0x27   : > { %s433_s29 = sld [smem:[#allocation4 + %s1707_s25]] (!%p372_p1)  ;;  %p441_p3 = scmp.lt.s32.totalorder (!%p372_p1), %s1253_s30, 5 }
  0x28   : > { %p1255_p6 = scmp.ne.s32.totalorder %s1703_s24, 0 }
  0x29   : > { %s2161_s30 = smov (!%p441_p3, %s1253_s30), 5 }
  0x2a   : > { %s1254_s12 = sshll.u32 %s2161_s30, 3  ;;  %s1887_s30 = scalar_lea.vmem [#allocation5], %s1249_s21 }
  0x2b   : > { %s423_s13 = sadd.s32 %s1703_s24, %s422_s20  ;;  %s1876_s0 = scalar_lea.vmem %s2116_s3, %s1254_s12 }
  0x2c   : > { %s1250_s16 = sshll.u32 %s423_s13, 4 }
  0x2d   : > { %s434_s17 = sadd.s32 %s1703_s24, %s433_s29  ;;  %p425_p4 = scmp.lt.s32.totalorder %s1250_s16, 47 }
  0x2e   : > { %p435_p5 = scmp.lt.s32.totalorder %s434_s17, 2  ;;  %451 = sbr.rel (%p1255_p6) target bundleno = 53 (0x35), region = 64 }
  0x2f   : > { %s2163_s16 = smov (!%p425_p4, %s1250_s16), 47 }
  0x30   : > { %s2165_s17 = smov (!%p435_p5, %s434_s17), 2  ;;  %s1320_s27 = sshll.u32 %s2163_s16, 3 }
  0x31   : > { %s1881_s22 = scalar_lea.vmem %s2114_s1, %s1320_s27  ;;  %s437_s29 = scalar_lea.vmem %s2115_s2, %s2165_s17 }
  0x33   : > { %v1722_v0 = vmov 0.0  }
  0x34   : > { %452 = vst [vmem:[#allocation2] sm:$0xff] %v1722_v0  ;;  %453 = vst [vmem:[#allocation2 + $0x8] sm:$0xff] %v1722_v0 }
  0x35 PF: > { %v1553_v1 = vld [vmem:[%s2117_s4 + $0x78] sm:$0xff]   ;;  %v1555_v3 = vld [vmem:[%s2117_s4 + $0x70] sm:$0xff]   ;;  %v1557_v5 = vld [vmem:[%s2117_s4 + $0x68] sm:$0xff]   ;;  %v1723_v33 = vmov 0.0   ;;  %vm1724_vm0 = vmmov 0   ;;  %p1294_p7 = scmp.ne.s32.totalorder %s1703_s24, 1 }
  0x36   : > { %v1554_v2 = vld [vmem:[%s2117_s4 + $0x38] sm:$0xff]   ;;  %1322 = vmatprep.subr.bf16.mxu0 %v1553_v1  ;;  %v1556_v4 = vld [vmem:[%s2117_s4 + $0x30] sm:$0xff]   ;;  %v1558_v6 = vld [vmem:[%s2117_s4 + $0x28] sm:$0xff]   ;;  %1413 = vmatprep.subr.bf16.mxu1 %v1723_v33 }
  0x37   : > { %1323 = vmatpush3.bf16.msra.mxu0 %v1554_v2  ;;  %v1559_v7 = vld [vmem:[%s2117_s4 + $0x60] sm:$0xff]   ;;  %v1561_v9 = vld [vmem:[%s2117_s4 + $0x58] sm:$0xff]   ;;  %v1563_v11 = vld [vmem:[%s2117_s4 + $0x50] sm:$0xff]   ;;  %1429 = vmatprep.mubr.msk.bf16.mxu1 %vm1724_vm0, %v1723_v33 }
  0x38   : > { %1324 = vmatprep.subr.bf16.mxu0 %v1555_v3  ;;  %v1560_v8 = vld [vmem:[%s2117_s4 + $0x20] sm:$0xff]   ;;  %v1562_v10 = vld [vmem:[%s2117_s4 + $0x18] sm:$0xff]   ;;  %v1564_v13 = vld [vmem:[%s2117_s4 + $0x10] sm:$0xff]  }
  0x39   : > { %v1571_v12 = vld [vmem:[%s1881_s22 + $0x4] ss:$8 sps:$4 sm:$0xff]   ;;  %v1569_v18 = vld [vmem:[%s1881_s22] ss:$8 sps:$4 sm:$0xff]   ;;  %v1572_v19 = vld [vmem:[%s1881_s22 + $0x14] ss:$8 sps:$4 sm:$0xff]  }
  0x3a   : > { %710 = vmatprep.mubr.bf16.mxu0 %v1571_v12  ;;  %v1565_v14 = vld [vmem:[%s2117_s4 + $0x48] sm:$0xff]   ;;  %v1567_v16 = vld [vmem:[%s2117_s4 + $0x40] sm:$0xff]   ;;  %v1574_v20 = vld [vmem:[%s1881_s22 + $0x10] ss:$8 sps:$4 sm:$0xff]  }
  0x3b   : > { %1325 = vmatpush3.bf16.msra.mxu0 %v1556_v4  ;;  %v1566_v15 = vld [vmem:[%s2117_s4 + $0x8] sm:$0xff]   ;;  %v1568_v17 = vld [vmem:[%s2117_s4] sm:$0xff]   ;;  %v1578_v23 = vld [vmem:[%s1881_s22 + $0x34] ss:$8 sps:$4 sm:$0xff]  }
  0x3c   : > { %1326 = vmatprep.subr.bf16.mxu0 %v1557_v5  ;;  %v1575_v21 = vld [vmem:[%s1881_s22 + $0x24] ss:$8 sps:$4 sm:$0xff]   ;;  %v1577_v22 = vld [vmem:[%s1881_s22 + $0x20] ss:$8 sps:$4 sm:$0xff]   ;;  %v1580_v24 = vld [vmem:[%s1881_s22 + $0x30] ss:$8 sps:$4 sm:$0xff]  }
  0x3d   : > { %v1581_v25 = vld [vmem:[%s1881_s22 + $0x44] ss:$8 sps:$4 sm:$0xff]   ;;  %v1583_v26 = vld [vmem:[%s1881_s22 + $0x40] ss:$8 sps:$4 sm:$0xff]   ;;  %v1584_v27 = vld [vmem:[%s1881_s22 + $0x54] ss:$8 sps:$4 sm:$0xff]  }
  0x3e   : > { %v1586_v28 = vld [vmem:[%s1881_s22 + $0x50] ss:$8 sps:$4 sm:$0xff]   ;;  %v1587_v29 = vld [vmem:[%s1881_s22 + $0x64] ss:$8 sps:$4 sm:$0xff]   ;;  %v1589_v30 = vld [vmem:[%s1881_s22 + $0x60] ss:$8 sps:$4 sm:$0xff]  }
  0x3f   : > { %1327 = vmatpush3.bf16.msra.mxu0 %v1558_v6  ;;  %v1590_v31 = vld [vmem:[%s1881_s22 + $0x74] ss:$8 sps:$4 sm:$0xff]   ;;  %v1592_v32 = vld [vmem:[%s1881_s22 + $0x70] ss:$8 sps:$4 sm:$0xff]   ;;  %s1288_s22 = sshll.u32 %s1707_s25, 4 }
  0x40   : > { %1328 = vmatprep.subr.bf16.mxu0 %v1559_v7 }
  0x43   : > { %1329 = vmatpush3.bf16.msra.mxu0 %v1560_v8 }
  0x44   : > { %1330 = vmatprep.subr.bf16.mxu0 %v1561_v9 }
  0x47   : > { %1331 = vmatpush3.bf16.msra.mxu0 %v1562_v10 }
  0x48   : > { %1332 = vmatprep.subr.bf16.mxu0 %v1563_v11 }
  0x4b   : > { %1333 = vmatpush3.bf16.msra.mxu0 %v1564_v13 }
  0x4c   : > { %1334 = vmatprep.subr.bf16.mxu0 %v1565_v14 }
  0x4f   : > { %1335 = vmatpush3.bf16.msra.mxu0 %v1566_v15 }
  0x50   : > { %1336 = vmatprep.subr.bf16.mxu0 %v1567_v16 }
  0x53   : > { %1337 = vmatpush3.bf16.msra.mxu0 %v1568_v17 }
  0x56   : > { %711 = vmatmul.mubr.bf16.vlgmr.msra.gmra.mxu0 %v1569_v18 }
  0x57   : > { %718 = vmatprep.mubr.bf16.mxu0 %v1572_v19 }
  0x5e   : > { %719 = vmatmul.mubr.bf16.gmra.mxu0 %v1574_v20  ;;  %v776_v20 = vlaneseq }
  0x5f   : > { %726 = vmatprep.mubr.bf16.mxu0 %v1575_v21 }
  0x66   : > { %727 = vmatmul.mubr.bf16.gmra.mxu0 %v1577_v22 }
  0x67   : > { %734 = vmatprep.mubr.bf16.mxu0 %v1578_v23 }
  0x6e   : > { %735 = vmatmul.mubr.bf16.gmra.mxu0 %v1580_v24  ;;  %v777_v24 = vshrl.u32 %v776_v20, 7 }
  0x6f   : > { %742 = vmatprep.mubr.bf16.mxu0 %v1581_v25 }
  0x76   : > { %743 = vmatmul.mubr.bf16.gmra.mxu0 %v1583_v26 }
  0x77   : > { %750 = vmatprep.mubr.bf16.mxu0 %v1584_v27  ;;  %v778_v27 = vadd.s32 8, %v777_v24 }
  0x7e   : > { %751 = vmatmul.mubr.bf16.gmra.mxu0 %v1586_v28 }
  0x7f   : > { %758 = vmatprep.mubr.bf16.mxu0 %v1587_v29  ;;  %v779_v29 = vstv %s1288_s22 }
  0x86   : > { %759 = vmatmul.mubr.bf16.gmra.mxu0 %v1589_v30  ;;  %v780_v30 = vadd.s32 %v779_v29, %v777_v24 }
  0x87   : > { %766 = vmatprep.mubr.bf16.mxu0 %v1590_v31  ;;  %v781_v31 = vadd.s32 %v779_v29, %v778_v27 }
  0x8e   : > { %767 = vmatmul.mubr.bf16.gmra.mxu0 %v1592_v32  ;;  %v1289_v32 = vld [vmem:[%s437_s29] ss:$0 sm:$0xff] }
  0x8f   : > { %vm787_vm1 = vcmp.eq.s32.totalorder %v780_v30, %v1289_v32  ;;  %vm788_vm2 = vcmp.eq.s32.totalorder %v781_v31, %v1289_v32 }
  0x90   : > { %vm1292_vm3 = vmpackc.low %vm788_vm2, %vm787_vm1 }
 0x116   : > { %v1338_v34 = vpop.f32.mrf.mxu0 }
 0x118   : > { %v1339_v35 = vpop.f32.mrf.mxu0 }
 0x119   : > { %v1956_v36 = vadd.f32 %v1339_v35, %v1338_v34  ;;  %v1725_v34 = vmov 1.0|1.0   ;;  %v794_v35 = vld [vmem:[#allocation2] sm:$0xff] }
 0x11a   : > { %v1341_v37 = vpop.f32.mrf.mxu0 }
 0x11c   : > { %v1342_v38 = vpop.f32.mrf.mxu0 }
 0x11d   : > { %v1958_v39 = vadd.f32 %v1342_v38, %v1341_v37 }
 0x11e   : > { %v1344_v40 = vpop.f32.mrf.mxu0 }
 0x11f   : > { %v796_v41 = vpack.c.bf16 %v1958_v39, %v1956_v36 }
 0x120   : > { %v1345_v42 = vpop.f32.mrf.mxu0 }
 0x121   : > { %v1962_v43 = vadd.f32 %v1345_v42, %v1344_v40  ;;  %v795_v42 = vld [vmem:[#allocation2 + $0x8] sm:$0xff] }
 0x122   : > { %v1347_v44 = vpop.f32.mrf.mxu0 }
 0x124   : > { %v1348_v45 = vpop.f32.mrf.mxu0 }
 0x125   : > { %v1964_v46 = vadd.f32 %v1348_v45, %v1347_v44 }
 0x126   : > { %v1350_v47 = vpop.f32.mrf.mxu0 }
 0x127   : > { %v797_v48 = vpack.c.bf16 %v1964_v46, %v1962_v43 }
 0x128   : > { %v1351_v49 = vpop.f32.mrf.mxu0 }
 0x129   : > { %v1352_v50 = vadd.f32 %v1351_v49, %v1350_v47 }
 0x12a   : > { %v1353_v51 = vpop.f32.mrf.mxu0 }
 0x12c   : > { %v1354_v52 = vpop.f32.mrf.mxu0 }
 0x12d   : > { %v1355_v25 = vadd.f32 %v1354_v52, %v1353_v51 }
 0x12e   : > { %v1356_v53 = vpop.f32.mrf.mxu0 }
 0x12f   : > { %v798_v28 = vpack.c.bf16 %v1355_v25, %v1352_v50 }
 0x130   : > { %v1357_v54 = vpop.f32.mrf.mxu0 }
 0x131   : > { %v1358_v23 = vadd.f32 %v1357_v54, %v1356_v53 }
 0x132   : > { %v1359_v55 = vpop.f32.mrf.mxu0 }
 0x134   : > { %v1360_v56 = vpop.f32.mrf.mxu0 }
 0x135   : > { %v1361_v21 = vadd.f32 %v1360_v56, %v1359_v55 }
 0x136   : > { %v1362_v57 = vpop.f32.mrf.mxu0 }
 0x137   : > { %v799_v26 = vpack.c.bf16 %v1361_v21, %v1358_v23 }
 0x138   : > { %v1363_v58 = vpop.f32.mrf.mxu0 }
 0x139   : > { %v1364_v19 = vadd.f32 %v1363_v58, %v1362_v57 }
 0x13a   : > { %v1365_v59 = vpop.f32.mrf.mxu0 }
 0x13c   : > { %v1366_v60 = vpop.f32.mrf.mxu0 }
 0x13d   : > { %v1367_v17 = vadd.f32 %v1366_v60, %v1365_v59 }
 0x13e   : > { %v1368_v61 = vpop.f32.mrf.mxu0 }
 0x13f   : > { %v800_v22 = vpack.c.bf16 %v1367_v17, %v1364_v19 }
 0x140   : > { %v1369_v62 = vpop.f32.mrf.mxu0 }
 0x141   : > { %v1370_v16 = vadd.f32 %v1369_v62, %v1368_v61 }
 0x142   : > { %v1371_v63 = vpop.f32.mrf.mxu0 }
 0x144   : > { %v1372_v0 = vpop.f32.mrf.mxu0 }
 0x145   : > { %v1373_v14 = vadd.f32 %v1372_v0, %v1371_v63 }
 0x146   : > { %v1374_v1 = vpop.f32.mrf.mxu0 }
 0x147   : > { %v801_v18 = vpack.c.bf16 %v1373_v14, %v1370_v16 }
 0x148   : > { %v1375_v2 = vpop.f32.mrf.mxu0 }
 0x149   : > { %v1376_v13 = vadd.f32 %v1375_v2, %v1374_v1 }
 0x14a   : > { %v1377_v3 = vpop.f32.mrf.mxu0 }
 0x14c   : > { %v1378_v4 = vpop.f32.mrf.mxu0 }
 0x14d   : > { %v1379_v11 = vadd.f32 %v1378_v4, %v1377_v3 }
 0x14e   : > { %v1380_v5 = vpop.f32.mrf.mxu0 }
 0x14f   : > { %v802_v15 = vpack.c.bf16 %v1379_v11, %v1376_v13 }
 0x150   : > { %v1381_v6 = vpop.f32.mrf.mxu0 }
 0x151   : > { %v1382_v9 = vadd.f32 %v1381_v6, %v1380_v5 }
 0x152   : > { %v1383_v7 = vpop.f32.mrf.mxu0 }
 0x154   : > { %v1384_v8 = vpop.f32.mrf.mxu0 }
 0x155   : > { %v1385_v10 = vadd.f32 %v1384_v8, %v1383_v7 }
 0x157   : > { %v803_v12 = vpack.c.bf16 %v1385_v10, %v1382_v9 }
 0x159   : > { %1414 = vmatpush3.bf16.msra.mxu1 %v803_v12 }
 0x15a   : > { %1415 = vmatprep.subr.bf16.mxu1 %v1723_v33 }
 0x15d   : > { %1416 = vmatpush3.bf16.msra.mxu1 %v802_v15 }
 0x15e   : > { %1417 = vmatprep.subr.bf16.mxu1 %v1723_v33 }
 0x161   : > { %1418 = vmatpush3.bf16.msra.mxu1 %v801_v18 }
 0x162   : > { %1419 = vmatprep.subr.bf16.mxu1 %v1723_v33 }
 0x165   : > { %1420 = vmatpush3.bf16.msra.mxu1 %v800_v22 }
 0x166   : > { %1421 = vmatprep.subr.bf16.mxu1 %v1723_v33 }
 0x169   : > { %1422 = vmatpush3.bf16.msra.mxu1 %v799_v26 }
 0x16a   : > { %1423 = vmatprep.subr.bf16.mxu1 %v1723_v33 }
 0x16d   : > { %1424 = vmatpush3.bf16.msra.mxu1 %v798_v28 }
 0x16e   : > { %1425 = vmatprep.subr.bf16.mxu1 %v1723_v33 }
 0x171   : > { %1426 = vmatpush3.bf16.msra.mxu1 %v797_v48 }
 0x172   : > { %1427 = vmatprep.subr.bf16.mxu1 %v1723_v33 }
 0x175   : > { %1428 = vmatpush3.bf16.msra.mxu1 %v796_v41 }
 0x178   : > { %1430 = vmatmul.mubr.msk.bf16.vlgmr.msra.gmra.mxu1 %vm1292_vm3, %v1725_v34 }
 0x238   : > { %v838_v37 = vpop.f32.mrf.mxu1 }
 0x239   : > { %v845_v38 = vadd.f32 %v838_v37, %v794_v35 }
 0x23a   : > { %v1431_v40 = vpop.f32.mrf.mxu1 }
 0x23b   : > { %847 = vst [vmem:[#allocation2] sm:$0xff] %v845_v38  ;;  %852 = sbr.rel (%p1294_p7) target bundleno = 1323 (0x52b), region = 68 }
 0x23c   : > { %v841_v43 = vpop.f32.mrf.mxu1 }
 0x23d   : > { %v846_v44 = vadd.f32 %v841_v43, %v795_v42 }
 0x23e   : > { %v1432_v45 = vpop.f32.mrf.mxu1 }
 0x23f   : > { %848 = vst [vmem:[#allocation2 + $0x8] sm:$0xff] %v846_v44 }
 0x240   : > { %v1593_v33 = vld [vmem:[%s2118_s5 + $0x38] sm:$0xff]   ;;  %v1726_v36 = vmov 0.0   ;;  %v1594_v39 = vld [vmem:[%s2118_s5 + $0x30] sm:$0xff]   ;;  %vm1727_vm4 = vmmov 0   ;;  %v1595_v41 = vld [vmem:[%s2118_s5 + $0x28] sm:$0xff]   ;;  %v1084_v15 = vand.u32 127, %v776_v20 }
 0x241   : > { %1433 = vmatprep.subr.bf16.mxu0 %v1726_v36  ;;  %1453 = vmatprep.subr.bf16.mxu1 %v1726_v36  ;;  %v1601_v46 = vld [vmem:[%s2120_s7 + $0x38] sm:$0xff]   ;;  %v1596_v47 = vld [vmem:[%s2118_s5 + $0x20] sm:$0xff]   ;;  %v1602_v48 = vld [vmem:[%s2120_s7 + $0x30] sm:$0xff]  }
 0x242   : > { %1434 = vmatpush3.bf16.msra.mxu0 %v1593_v33  ;;  %1449 = vmatprep.mubr.msk.bf16.mxu0 %vm1727_vm4, %v1726_v36  ;;  %v1597_v49 = vld [vmem:[%s2118_s5 + $0x18] sm:$0xff]   ;;  %v1603_v50 = vld [vmem:[%s2120_s7 + $0x28] sm:$0xff]   ;;  %v1598_v51 = vld [vmem:[%s2118_s5 + $0x10] sm:$0xff]   ;;  %vm1085_vm5 = vcmp.lt.s32.totalorder %v1084_v15, 64 }
 0x243   : > { %1435 = vmatprep.subr.bf16.mxu0 %v1726_v36  ;;  %1469 = vmatprep.mubr.msk.bf16.mxu1 %vm1727_vm4, %v1726_v36  ;;  %v1604_v52 = vld [vmem:[%s2120_s7 + $0x20] sm:$0xff]   ;;  %v1599_v53 = vld [vmem:[%s2118_s5 + $0x8] sm:$0xff]   ;;  %v1605_v54 = vld [vmem:[%s2120_s7 + $0x18] sm:$0xff]  }
 0x244   : > { %1454 = vmatpush3.bf16.msra.mxu1 %v1601_v46  ;;  %v1600_v55 = vld [vmem:[%s2118_s5] sm:$0xff]   ;;  %v1606_v59 = vld [vmem:[%s2120_s7 + $0x10] sm:$0xff]   ;;  %v1607_v60 = vld [vmem:[%s2120_s7 + $0x8] sm:$0xff]  }
 0x245   : > { %1455 = vmatprep.subr.bf16.mxu1 %v1726_v36  ;;  %v853_v56 = vld [vmem:[#allocation2] sm:$0xff] }
 0x246   : > { %1436 = vmatpush3.bf16.msra.mxu0 %v1594_v39  ;;  %v854_v57 = vld [vmem:[#allocation2 + $0x8] sm:$0xff]  ;;  %v1608_v61 = vld [vmem:[%s2120_s7] sm:$0xff]  }
 0x247   : > { %1437 = vmatprep.subr.bf16.mxu0 %v1726_v36  ;;  %v855_v58 = vpack.c.bf16 %v854_v57, %v853_v56  ;;  %v1295_v62 = vld [vmem:[%s2119_s6] ss:$0 sm:$0xff] }
 0x248   : > { %1456 = vmatpush3.bf16.msra.mxu1 %v1602_v48  ;;  %v1304_v8 = vld [vmem:[%s2121_s8] ss:$0 sm:$0xff] }
 0x249   : > { %1457 = vmatprep.subr.bf16.mxu1 %v1726_v36  ;;  %v1313_v34 = vld [vmem:[%s2122_s9] ss:$0 sm:$0xff] }
 0x24a   : > { %1438 = vmatpush3.bf16.msra.mxu0 %v1595_v41  ;;  %v1314_v37 = vld [vmem:[%s2123_s10] ss:$0 sm:$0xff]  ;;  %v1131_v41 = vld [vmem:[%s1876_s0 + $0x8] sm:$0xff] }
 0x24b   : > { %1439 = vmatprep.subr.bf16.mxu0 %v1726_v36  ;;  %v1130_v44 = vld [vmem:[%s1876_s0] sm:$0xff] }
 0x24c   : > { %1458 = vmatpush3.bf16.msra.mxu1 %v1603_v50 }
 0x24d   : > { %1459 = vmatprep.subr.bf16.mxu1 %v1726_v36 }
 0x24e   : > { %1440 = vmatpush3.bf16.msra.mxu0 %v1596_v47 }
 0x24f   : > { %1441 = vmatprep.subr.bf16.mxu0 %v1726_v36 }
 0x250   : > { %1460 = vmatpush3.bf16.msra.mxu1 %v1604_v52 }
 0x251   : > { %1461 = vmatprep.subr.bf16.mxu1 %v1726_v36 }
 0x252   : > { %1442 = vmatpush3.bf16.msra.mxu0 %v1597_v49 }
 0x253   : > { %1443 = vmatprep.subr.bf16.mxu0 %v1726_v36 }
 0x254   : > { %1462 = vmatpush3.bf16.msra.mxu1 %v1605_v54 }
 0x255   : > { %1463 = vmatprep.subr.bf16.mxu1 %v1726_v36 }
 0x256   : > { %1444 = vmatpush3.bf16.msra.mxu0 %v1598_v51 }
 0x257   : > { %1445 = vmatprep.subr.bf16.mxu0 %v1726_v36 }
 0x258   : > { %1464 = vmatpush3.bf16.msra.mxu1 %v1606_v59 }
 0x259   : > { %1465 = vmatprep.subr.bf16.mxu1 %v1726_v36 }
 0x25a   : > { %1446 = vmatpush3.bf16.msra.mxu0 %v1599_v53 }
 0x25b   : > { %1447 = vmatprep.subr.bf16.mxu0 %v1726_v36 }
 0x25c   : > { %1466 = vmatpush3.bf16.msra.mxu1 %v1607_v60 }
 0x25d   : > { %1467 = vmatprep.subr.bf16.mxu1 %v1726_v36 }
 0x25e   : > { %1448 = vmatpush3.bf16.msra.mxu0 %v1600_v55 }
 0x260   : > { %1468 = vmatpush3.bf16.msra.mxu1 %v1608_v61 }
 0x261   : > { %1450 = vmatmul.mubr.bf16.vlgmr.msra.gmra.mxu0 %v855_v58 }
 0x321   : > { %v961_v63 = vpop.f32.mrf.mxu0 }
 0x322   : > { %v962_v1 = vadd.f32 %v1295_v62, %v961_v63 }
 0x323   : > { %v1451_v0 = vpop.f32.mrf.mxu0 }
 0x324   : > { %v968_v5 = vmax.f32 %v962_v1, 0.0 }
 0x325   : > { %v964_v2 = vpop.f32.mrf.mxu0 }
 0x326   : > { %v965_v3 = vadd.f32 %v1295_v62, %v964_v2 }
 0x327   : > { %v1452_v4 = vpop.f32.mrf.mxu0 }
 0x328   : > { %v969_v6 = vmax.f32 %v965_v3, 0.0 }
 0x32a   : > { %v970_v7 = vpack.c.bf16 %v969_v6, %v968_v5 }
 0x32c   : > { %1470 = vmatmul.mubr.bf16.vlgmr.msra.gmra.mxu1 %v970_v7 }
 0x3ec   : > { %v1076_v9 = vpop.f32.mrf.mxu1 }
 0x3ed   : > { %v1077_v10 = vadd.f32 %v1304_v8, %v1076_v9 }
 0x3ee   : > { %v1471_v11 = vpop.f32.mrf.mxu1 }
 0x3ef   : > { %1086 = vadd.xlane.f32.xlu0 %v1077_v10 }
 0x3f0   : > { %v1079_v12 = vpop.f32.mrf.mxu1 }
 0x3f1   : > { %v1080_v13 = vadd.f32 %v1304_v8, %v1079_v12 }
 0x3f2   : > { %v1472_v14 = vpop.f32.mrf.mxu1 }
 0x3f3   : > { %1088 = vadd.xlane.f32.xlu0 %v1080_v13 }
 0x478   : > { %v1087_v16 = vpop.xlane.xlu0 %1086 }
 0x479   : > { %v1090_v17 = vmul.f32 0.015625, %v1087_v16 }
 0x47b   : > { %v1092_v18 = vsub.f32 %v1077_v10, %v1090_v17 }
 0x47c   : > { %v1089_v19 = vpop.xlane.xlu0 %1088 }
 0x47d   : > { %v1091_v21 = vmul.f32 0.015625, %v1089_v19  ;;  %v1094_v22 = vsel %vm1085_vm5, %v1092_v18, 0.0 }
 0x47e   : > { %v1096_v23 = vmul.f32 %v1094_v22, %v1094_v22 }
 0x47f   : > { %v1093_v24 = vsub.f32 %v1080_v13, %v1091_v21 }
 0x480   : > { %1098 = vadd.xlane.f32.xlu1 %v1096_v23 }
 0x481   : > { %v1095_v25 = vsel %vm1085_vm5, %v1093_v24, 0.0 }
 0x482   : > { %v1097_v26 = vmul.f32 %v1095_v25, %v1095_v25 }
 0x484   : > { %1100 = vadd.xlane.f32.xlu1 %v1097_v26 }
 0x509   : > { %v1099_v27 = vpop.xlane.xlu1 %1098 }
 0x50a   : > { %v1102_v28 = vmul.f32 0.015625, %v1099_v27 }
 0x50c   : > { %v1104_v29 = vadd.f32 1e-05, %v1102_v28 }
 0x50d   : > { %v1101_v30 = vpop.xlane.xlu1 %1100 }
 0x50e   : > { %1609 = vrsqrt.f32 %v1104_v29  ;;  %v1103_v20 = vmul.f32 0.015625, %v1101_v30 }
 0x510   : > { %v1105_v31 = vadd.f32 1e-05, %v1103_v20 }
 0x512   : > { %1611 = vrsqrt.f32 %v1105_v31 }
 0x51b   : > { %v1610_v32 = vpop.eup %1609 }
 0x51c   : > { %v1108_v35 = vmul.f32 %v1610_v32, %v1094_v22 }
 0x51e   : > { %v1117_v38 = vmul.f32 %v1313_v34, %v1108_v35 }
 0x51f   : > { %v1612_v40 = vpop.eup %1611 }
 0x520   : > { %v1126_v42 = vadd.f32 %v1314_v37, %v1117_v38  ;;  %v1109_v43 = vmul.f32 %v1612_v40, %v1095_v25 }
 0x522   : > { %v1128_v45 = vmax.f32 %v1126_v42, 0.0  ;;  %v1118_v33 = vmul.f32 %v1313_v34, %v1109_v43 }
 0x524   : > { %v1132_v36 = vadd.f32 %v1130_v44, %v1128_v45  ;;  %v1127_v39 = vadd.f32 %v1314_v37, %v1118_v33 }
 0x526   : > { %1134 = vst [vmem:[%s1887_s30] sm:$0xff] %v1132_v36  ;;  %v1129_v46 = vmax.f32 %v1127_v39, 0.0 }
 0x528   : > { %v1133_v47 = vadd.f32 %v1131_v41, %v1129_v46 }
 0x52a   : > { %1135 = vst [vmem:[%s1887_s30 + $0x8] sm:$0xff] %v1133_v47 }
 0x52b PF: > { %s1321_s15 = sshll.u32 %s1707_s25, 8  ;;  %s1150_s18 = sshll.u32 %s1887_s30, 4  ;;  %s2058_s18 = int_to_ptr.vmem [resolvable:$true] %s1150_s18 }
 0x52c   : > { %s2055_s29 = scalar_lea.hbm %s2124_s11, %s1321_s15  ;;  %s2142_s19 = sand.u32 1, %s1695_s23  }
 0x52d   : > { %s2062_s0 = scalar_lea.sflag [#allocation6], %s2142_s19  ;;  %s1625_s21 = scalar_lea.vmem %s2058_s18, 256 }
 0x52e   : > { %p1626_p9 = scmp.ne.s32.totalorder %s2058_s18, %s1625_s21  ;;  %s1728_s25 = smov [#allocation5]  }
 0x52f   : > { %s1629_s24 = sshll.u32 %s1728_s25, 4  ;;  %s1630_s24 = int_to_ptr.vmem [resolvable:$false] %s1629_s24 }
 0x530   : > { %p1627_p10 = pnand %p1626_p9, %p1843_p8  ;;  %s1631_s16 = scalar_lea.vmem %s1630_s24, 512 }
 0x531   : > { %p1632_p12 = scmp.lt.s32.totalorder %s2058_s18, %s1630_s24  ;;  %p1633_p13 = scmp.lt.s32.totalorder %s1631_s16, %s1625_s21 }
 0x532   : > { %p1628_p11 = pneg %p1627_p10 }
 0x533   : > { %p1634_p1 = por %p1633_p13, %p1632_p12 }
 0x535   : > { %p1635_p2 = pnand %p1634_p1, %p1628_p11 }
 0x537   : > { %1638 = shalt.err (!%p1635_p2)
}
 0x538   : > { %s1639_s30 = scalar_lea.hbm %s2055_s29, 256  ;;  %s1643_s26 = scalar_lea.hbm %s2124_s11, 768 }
 0x539   : > { %p1640_p3 = scmp.ne.s32.totalorder %s2055_s29, %s1639_s30  ;;  %p1644_p6 = scmp.lt.s32.totalorder %s2055_s29, %s2124_s11 }
 0x53a   : > { %p1645_p7 = scmp.lt.s32.totalorder %s1643_s26, %s1639_s30 }
 0x53b   : > { %p1641_p4 = pnand %p1640_p3, %p1843_p8 }
 0x53c   : > { %p1646_p9 = por %p1645_p7, %p1644_p6 }
 0x53d   : > { %p1642_p5 = pneg %p1641_p4 }
 0x53f   : > { %p1647_p10 = pnand %p1646_p9, %p1642_p5 }
 0x541   : > { %1650 = shalt.err (!%p1647_p10)
}
 0x542   : > { %s1729_s15 = smov 128   ;;  %s1730_s27 = smov 8  }
 0x543   : > { %1473 = dma.vmem_to_hbm [thread:$0]  (%p1843_p8), %s2058_s18, 256, %s2055_s29, %s2062_s0, %s1729_s15, %s1729_s15, %s1730_s27  }
 0x544 PF: > { %s2143_s17 = sld [smem:[#allocation9_spill]]  ;;  %p1479_p11 = scmp.ge.s32.totalorder %s1719_s28, 2 }
 0x546   : > { %p1476_p12 = pnand %p1479_p11, %p1853_p0 }
 0x548   : > { %p1477_p13 = pneg %p1476_p12 }
 0x54a   : > { %s1165_s21 = sand.u32 1, %s2143_s17  }
 0x54b   : > { %s1166_s25 = scalar_lea.sflag [#allocation6], %s1165_s21 }
 0x54c   : > { %1686 = dma.done.wait (%p1477_p13), %s1166_s25, 256  }
 0x54d   : > { %1688 = vsyncadd (%p1477_p13), %s1166_s25, 4294967040  ;;  %s30_s28 = sadd.s32 1, %s1719_s28   ;;  %s2145_s24 = sld [smem:[#allocation10_spill]] }
 0x54e   : > { %p27_p1 = scmp.ge.s32.totalorder %s30_s28, 8   ;;  %s2146_s0 = sld [smem:[#allocation16_spill]] }
 0x54f   : > { %s2147_s14 = sld [smem:[#allocation11_spill]]  ;;  %s2151_s22 = smov %s1695_s23 }
 0x550   : > { %s2148_s25 = sld [smem:[#allocation12_spill]] }
 0x551   : > { %s2149_s26 = sld [smem:[#allocation13_spill]]  ;;  %29 = sbr.rel (!%p27_p1) target bundleno = 20 (0x14), region = 109 }
 0x552   : > { %s2150_s27 = sld [smem:[#allocation14_spill]] }
 0x553   : > { %s2152_s23 = smov %s2145_s24 }
 0x555   : > { %s2153_s24 = smov %s2147_s14 }
 0x556   :  { %1171 = vsyncpa [#allocation6], 1 }
 0x557   :  { %1173 = vsyncpa [#allocation6 + $0x1], 1 }

</bundles_post_ra>
